<compile_context>
chip_gen: v6e
topology: v6e:2x2x1
jax: 0.10.0
libtpu: 0.0.40
codegen_flags: <defaults>
</compile_context>

<pallas_src>
import math

import jax
import jax.numpy as jnp
from jax.experimental import pallas as pl
from jax.experimental.pallas import tpu as pltpu

FREQ_EMB_SIZE = 256       # frequency_embedding_size (even -> no zero-pad branch needed)
HIDDEN_SIZE = 32          # hidden_size
MAX_PERIOD = 10000.0
ROW_TILE = 2048           # batch-row tile (op is overhead/store bound; big tiles win)


def timestep_embedder_kernel(t_ref, freqs_ref, w1c_ref, w1s_ref, b1_ref,
                             w2_ref, b2_ref, out_ref):
    # --- sinusoidal timestep embedding (freqs precomputed once in prepare) ---
    args = t_ref[...] * freqs_ref[...]            # (TN, 1) * (1, half) -> (TN, half)
    cos_e = jnp.cos(args)
    sin_e = jnp.sin(args)
    # NOTE: FREQ_EMB_SIZE is even, so the PyTorch `if dim % 2` zero-pad branch is dead.

    # --- MLP: Linear -> SiLU -> Linear (MXU matmuls) ---
    # First Linear split over the cos/sin halves of w1: identical to
    # concat([cos, sin]) @ w1 but without the (TN, 256) concat intermediate.
    h = (jnp.dot(cos_e, w1c_ref[...], preferred_element_type=jnp.float32)
         + jnp.dot(sin_e, w1s_ref[...], preferred_element_type=jnp.float32)
         + b1_ref[...])
    h = h * jax.nn.sigmoid(h)                     # SiLU
    out = jnp.dot(h, w2_ref[...], preferred_element_type=jnp.float32) + b2_ref[...]
    out_ref[...] = out.astype(out_ref.dtype)


def prepare_params(w1, b1, w2, b2):
    """One-time weight preprocessing (hoisted out of the per-call forward).

    w1: (F, H), b1: (H,), w2: (H, H2), b2: (H2,) -- all stored as (in, out).
    """
    half = FREQ_EMB_SIZE // 2
    freqs = jnp.exp((-math.log(MAX_PERIOD) / half)
                    * jnp.arange(half, dtype=jnp.float32)).reshape(1, half)
    w1c = w1[:half]                               # (half, H)  cos half (concat order)
    w1s = w1[half:]                               # (half, H)  sin half
    return dict(freqs=freqs, w1c=w1c, w1s=w1s, b1=b1.reshape(1, -1),
                w2=w2, b2=b2.reshape(1, -1))


def _round_up(x, m):
    return ((x + m - 1) // m) * m


def timestep_embedder(t, params, *, row_tile=ROW_TILE):
    """t: (N,) f32 timesteps. params: output of prepare_params(). Returns (N, H2) f32."""
    n = t.shape[0]
    half = FREQ_EMB_SIZE // 2
    hid = params["w2"].shape[0]
    h_out = params["w2"].shape[1]

    # Row tile: full batch if tiny; otherwise at least 2 grid steps (so the
    # "parallel" axis shards across both TensorCores on v7x), capped at
    # row_tile and rounded to a multiple of 8 sublanes.
    if n <= 8:
        tn = n
    else:
        tn = min(min(row_tile, n), max(8, _round_up(pl.cdiv(n, 2), 8)))
    grid = (pl.cdiv(n, tn),)

    t2d = t.astype(jnp.float32).reshape(n, 1)
    const2d = lambda i: (0, 0)                    # weights stay resident across tiles

    cost = pl.CostEstimate(
        flops=2 * n * (FREQ_EMB_SIZE * hid + hid * h_out),
        transcendentals=n * (FREQ_EMB_SIZE + hid),
        bytes_accessed=4 * (n * (1 + h_out)
                            + half + FREQ_EMB_SIZE * hid + hid
                            + hid * h_out + h_out),
    )

    out = pl.pallas_call(
        timestep_embedder_kernel,
        out_shape=jax.ShapeDtypeStruct((n, h_out), jnp.float32),
        grid=grid,
        in_specs=[
            pl.BlockSpec((tn, 1), lambda i: (i, 0)),        # t rows, tiled over grid
            pl.BlockSpec((1, half), const2d),               # freqs
            pl.BlockSpec((half, hid), const2d),             # w1 cos half
            pl.BlockSpec((half, hid), const2d),             # w1 sin half
            pl.BlockSpec((1, hid), const2d),                # b1
            pl.BlockSpec((hid, h_out), const2d),            # w2
            pl.BlockSpec((1, h_out), const2d),              # b2
        ],
        out_specs=pl.BlockSpec((tn, h_out), lambda i: (i, 0)),
        compiler_params=pltpu.CompilerParams(
            dimension_semantics=("parallel",)),             # megacore split on v7x
        cost_estimate=cost,
    )(t2d, params["freqs"], params["w1c"], params["w1s"], params["b1"],
      params["w2"], params["b2"])

    return out


def reference(t, w1, b1, w2, b2):
    half = FREQ_EMB_SIZE // 2
    freqs = jnp.exp(-math.log(MAX_PERIOD) * jnp.arange(half, dtype=jnp.float32) / half)
    args = t.astype(jnp.float32)[:, None] * freqs[None]
    emb = jnp.concatenate([jnp.cos(args), jnp.sin(args)], axis=-1)
    h = emb @ w1 + b1
    h = h * jax.nn.sigmoid(h)
    return h @ w2 + b2


if __name__ == "__main__":
    key = jax.random.PRNGKey(0)
    k_t, k_w1, k_b1, k_w2, k_b2 = jax.random.split(key, 5)

    # Deterministic synthetic parameters (shapes from nn.Linear; stored as (in, out)).
    w1 = 0.02 * jax.random.normal(k_w1, (FREQ_EMB_SIZE, HIDDEN_SIZE), dtype=jnp.float32)
    b1 = 0.01 * jax.random.normal(k_b1, (HIDDEN_SIZE,), dtype=jnp.float32)
    w2 = 0.02 * jax.random.normal(k_w2, (HIDDEN_SIZE, HIDDEN_SIZE), dtype=jnp.float32)
    b2 = 0.01 * jax.random.normal(k_b2, (HIDDEN_SIZE,), dtype=jnp.float32)

    params = prepare_params(w1, b1, w2, b2)       # one-time weight prep (hoisted)

    # Small batch (single grid step, block == full array).
    N = 8
    t_small = jax.random.uniform(k_t, (N,), dtype=jnp.float32, minval=0.0, maxval=1000.0)
    out_small = timestep_embedder(t_small, params)
    jax.block_until_ready(out_small)
    ref_small = reference(t_small, w1, b1, w2, b2)
    assert out_small.shape == (N, HIDDEN_SIZE)
    assert jnp.allclose(out_small, ref_small, atol=1e-4, rtol=1e-4), "small-N mismatch"

    # Non-multiple-of-tile batch: 2 grid steps, partial (masked) last tile.
    N_odd = 500
    t_odd = jax.random.uniform(k_t, (N_odd,), dtype=jnp.float32, minval=0.0, maxval=1000.0)
    out_odd = timestep_embedder(t_odd, params)
    jax.block_until_ready(out_odd)
    ref_odd = reference(t_odd, w1, b1, w2, b2)
    assert out_odd.shape == (N_odd, HIDDEN_SIZE)
    assert jnp.allclose(out_odd, ref_odd, atol=1e-4, rtol=1e-4), "odd-N mismatch"

    # Larger batch exercising the big-tile / megacore path (2 x 2048-row tiles).
    N_big = 4096
    t_big = jax.random.uniform(k_t, (N_big,), dtype=jnp.float32, minval=0.0, maxval=1000.0)
    out_big = timestep_embedder(t_big, params)
    jax.block_until_ready(out_big)
    ref_big = reference(t_big, w1, b1, w2, b2)
    assert out_big.shape == (N_big, HIDDEN_SIZE)
    assert jnp.allclose(out_big, ref_big, atol=1e-4, rtol=1e-4), "large-N mismatch"

    print("KERNEL_OK")
</pallas_src>

<mosaic_0001>
module attributes {stable_mosaic.version = 11 : i64} {
  func.func @timestep_embedder_kernel(%arg0: i32, %arg1: memref<8x1xf32, #tpu.memory_space<vmem>>, %arg2: memref<1x128xf32, #tpu.memory_space<vmem>>, %arg3: memref<128x32xf32, #tpu.memory_space<vmem>>, %arg4: memref<128x32xf32, #tpu.memory_space<vmem>>, %arg5: memref<1x32xf32, #tpu.memory_space<vmem>>, %arg6: memref<32x32xf32, #tpu.memory_space<vmem>>, %arg7: memref<1x32xf32, #tpu.memory_space<vmem>>, %arg8: memref<8x32xf32, #tpu.memory_space<vmem>>) attributes {dimension_semantics = [#tpu.dimension_semantics<parallel>], iteration_bounds = array<i64: 1>, scalar_prefetch = 0 : i64, scratch_operands = 0 : i64, tpu.core_type = #tpu.core_type<tc>, window_params = [{transform_indices = @transform_0, window_bounds = array<i64: 8, 1>}, {pipeline_mode = #tpu.pipeline_mode<synchronous>, transform_indices = @transform_1, window_bounds = array<i64: 1, 128>}, {pipeline_mode = #tpu.pipeline_mode<synchronous>, transform_indices = @transform_2, window_bounds = array<i64: 128, 32>}, {pipeline_mode = #tpu.pipeline_mode<synchronous>, transform_indices = @transform_3, window_bounds = array<i64: 128, 32>}, {pipeline_mode = #tpu.pipeline_mode<synchronous>, transform_indices = @transform_4, window_bounds = array<i64: 1, 32>}, {pipeline_mode = #tpu.pipeline_mode<synchronous>, transform_indices = @transform_5, window_bounds = array<i64: 32, 32>}, {pipeline_mode = #tpu.pipeline_mode<synchronous>, transform_indices = @transform_6, window_bounds = array<i64: 1, 32>}, {transform_indices = @transform_7, window_bounds = array<i64: 8, 32>}]} {
    %c0 = arith.constant 0 : index
    %c0_0 = arith.constant 0 : index
    %0 = vector.load %arg1[%c0, %c0_0] : memref<8x1xf32, #tpu.memory_space<vmem>>, vector<8x1xf32>
    %c0_1 = arith.constant 0 : index
    %c0_2 = arith.constant 0 : index
    %1 = vector.load %arg2[%c0_1, %c0_2] : memref<1x128xf32, #tpu.memory_space<vmem>>, vector<1x128xf32>
    %2 = vector.broadcast %0 : vector<8x1xf32> to vector<8x128xf32>
    %3 = vector.broadcast %1 : vector<1x128xf32> to vector<8x128xf32>
    %4 = arith.mulf %2, %3 : vector<8x128xf32>
    %5 = math.cos %4 : vector<8x128xf32>
    %6 = math.sin %4 : vector<8x128xf32>
    %c0_3 = arith.constant 0 : index
    %c0_4 = arith.constant 0 : index
    %7 = vector.load %arg3[%c0_3, %c0_4] : memref<128x32xf32, #tpu.memory_space<vmem>>, vector<128x32xf32>
    %cst = arith.constant dense<0.000000e+00> : vector<8x32xf32>
    %8 = tpu.matmul %5, %7, %cst {dimension_numbers = #tpu.dot_dimension_numbers<[1], [0], [0], [1], [0, 0, 1, 1], [], []>} : vector<8x128xf32>, vector<128x32xf32>, vector<8x32xf32> -> vector<8x32xf32>
    %c0_5 = arith.constant 0 : index
    %c0_6 = arith.constant 0 : index
    %9 = vector.load %arg4[%c0_5, %c0_6] : memref<128x32xf32, #tpu.memory_space<vmem>>, vector<128x32xf32>
    %cst_7 = arith.constant dense<0.000000e+00> : vector<8x32xf32>
    %10 = tpu.matmul %6, %9, %cst_7 {dimension_numbers = #tpu.dot_dimension_numbers<[1], [0], [0], [1], [0, 0, 1, 1], [], []>} : vector<8x128xf32>, vector<128x32xf32>, vector<8x32xf32> -> vector<8x32xf32>
    %11 = arith.addf %8, %10 : vector<8x32xf32>
    %c0_8 = arith.constant 0 : index
    %c0_9 = arith.constant 0 : index
    %12 = vector.load %arg5[%c0_8, %c0_9] : memref<1x32xf32, #tpu.memory_space<vmem>>, vector<1x32xf32>
    %13 = vector.broadcast %12 : vector<1x32xf32> to vector<8x32xf32>
    %14 = arith.addf %11, %13 : vector<8x32xf32>
    %15 = arith.negf %14 : vector<8x32xf32>
    %16 = math.exp %15 : vector<8x32xf32>
    %cst_10 = arith.constant 1.000000e+00 : f32
    %17 = vector.broadcast %cst_10 : f32 to vector<8x32xf32>
    %18 = arith.addf %17, %16 : vector<8x32xf32>
    %19 = arith.divf %17, %18 : vector<8x32xf32>
    %20 = arith.mulf %14, %19 : vector<8x32xf32>
    %c0_11 = arith.constant 0 : index
    %c0_12 = arith.constant 0 : index
    %21 = vector.load %arg6[%c0_11, %c0_12] : memref<32x32xf32, #tpu.memory_space<vmem>>, vector<32x32xf32>
    %cst_13 = arith.constant dense<0.000000e+00> : vector<8x32xf32>
    %22 = tpu.matmul %20, %21, %cst_13 {dimension_numbers = #tpu.dot_dimension_numbers<[1], [0], [0], [1], [0, 0, 1, 1], [], []>} : vector<8x32xf32>, vector<32x32xf32>, vector<8x32xf32> -> vector<8x32xf32>
    %c0_14 = arith.constant 0 : index
    %c0_15 = arith.constant 0 : index
    %23 = vector.load %arg7[%c0_14, %c0_15] : memref<1x32xf32, #tpu.memory_space<vmem>>, vector<1x32xf32>
    %24 = vector.broadcast %23 : vector<1x32xf32> to vector<8x32xf32>
    %25 = arith.addf %22, %24 : vector<8x32xf32>
    %c0_16 = arith.constant 0 : index
    %c0_17 = arith.constant 0 : index
    %26 = vector.load %arg8[%c0_16, %c0_17] : memref<8x32xf32, #tpu.memory_space<vmem>>, vector<8x32xf32>
    tpu.vector_store %arg8[%c0_16, %c0_17], %25 {strides = array<i32>} : memref<8x32xf32, #tpu.memory_space<vmem>>, vector<8x32xf32>,
    return
  }
  func.func @transform_0(%arg0: i32) -> (i32, i32) {
    %c0_i32 = arith.constant 0 : i32
    %c0_i32_0 = arith.constant 0 : i32
    return %arg0, %c0_i32 : i32, i32
  }
  func.func @transform_1(%arg0: i32) -> (i32, i32) {
    %c0_i32 = arith.constant 0 : i32
    %c0_i32_0 = arith.constant 0 : i32
    %c0_i32_1 = arith.constant 0 : i32
    return %c0_i32, %c0_i32_0 : i32, i32
  }
  func.func @transform_2(%arg0: i32) -> (i32, i32) {
    %c0_i32 = arith.constant 0 : i32
    %c0_i32_0 = arith.constant 0 : i32
    %c0_i32_1 = arith.constant 0 : i32
    return %c0_i32, %c0_i32_0 : i32, i32
  }
  func.func @transform_3(%arg0: i32) -> (i32, i32) {
    %c0_i32 = arith.constant 0 : i32
    %c0_i32_0 = arith.constant 0 : i32
    %c0_i32_1 = arith.constant 0 : i32
    return %c0_i32, %c0_i32_0 : i32, i32
  }
  func.func @transform_4(%arg0: i32) -> (i32, i32) {
    %c0_i32 = arith.constant 0 : i32
    %c0_i32_0 = arith.constant 0 : i32
    %c0_i32_1 = arith.constant 0 : i32
    return %c0_i32, %c0_i32_0 : i32, i32
  }
  func.func @transform_5(%arg0: i32) -> (i32, i32) {
    %c0_i32 = arith.constant 0 : i32
    %c0_i32_0 = arith.constant 0 : i32
    %c0_i32_1 = arith.constant 0 : i32
    return %c0_i32, %c0_i32_0 : i32, i32
  }
  func.func @transform_6(%arg0: i32) -> (i32, i32) {
    %c0_i32 = arith.constant 0 : i32
    %c0_i32_0 = arith.constant 0 : i32
    %c0_i32_1 = arith.constant 0 : i32
    return %c0_i32, %c0_i32_0 : i32, i32
  }
  func.func @transform_7(%arg0: i32) -> (i32, i32) {
    %c0_i32 = arith.constant 0 : i32
    %c0_i32_0 = arith.constant 0 : i32
    return %arg0, %c0_i32 : i32, i32
  }
}

</mosaic_0001>

<bundles_post_ra>
// kernel: tpu_custom_call.1
= control target key start
LH: loop header
LB: loop body
LE: loop exit
PB: predicated region body
PF: predicated region fallthrough
CT: control target
= control target key end

     0   :  { %v713_v1 = vmov 0   ;;  %s949_s0 = inlined_call_operand.vmem [shape: f32[8,1], index: 0, kind: input, shape index: {}]   ;;  %s950_s1 = inlined_call_operand.vmem [shape: f32[1,128], index: 1, kind: input, shape index: {}]   ;;  %s951_s2 = inlined_call_operand.vmem [shape: f32[128,32], index: 2, kind: input, shape index: {}]   ;;  %s952_s3 = inlined_call_operand.vmem [shape: f32[128,32], index: 3, kind: input, shape index: {}]   ;;  %s953_s4 = inlined_call_operand.vmem [shape: f32[1,32], index: 4, kind: input, shape index: {}]   ;;  %s954_s5 = inlined_call_operand.vmem [shape: f32[32,32], index: 5, kind: input, shape index: {}]   ;;  %s955_s6 = inlined_call_operand.vmem [shape: f32[1,32], index: 6, kind: input, shape index: {}]   ;;  %s956_s7 = inlined_call_operand.hbm [shape: f32[8,32], index: 7, kind: output, shape index: {}]  }
   0x1   :  { %v27_v0 = vld [vmem:[%s949_s0] sm:$0xff]  ;;  %682 = vset.pattern.permute.xlu0 %v713_v1 }
   0x2   :  { %31 = vperm.xlu0 %682, %v27_v0  }
   0x3   :  { %12 = vsyncpa [#allocation3], 0  ;;  %v714_v2 = vmov 0.0   ;;  %v279_v3 = vld [vmem:[%s952_s3 + $0x78] sm:$0xff]  ;;  %v278_v5 = vld [vmem:[%s952_s3 + $0x70] sm:$0xff]  ;;  %vm715_vm0 = vmmov 0  }
   0x4   :  { %587 = vmatprep.subr.mxu0 %v714_v2  ;;  %622 = vmatprep.subr.mxu1 %v714_v2  ;;  %v263_v4 = vld [vmem:[%s951_s2 + $0x78] sm:$0xff]  ;;  %v262_v6 = vld [vmem:[%s951_s2 + $0x70] sm:$0xff]  ;;  %v277_v7 = vld [vmem:[%s952_s3 + $0x68] sm:$0xff]  ;;  %v716_v48 = vmov 683565275   ;;  %s722_s28 = smov [#allocation2]  }
   0x5   :  { %588 = vmatpush3.msra.mxu0 %v279_v3  ;;  %623 = vmatpush3.msra.mxu1 %v263_v4  ;;  %v261_v8 = vld [vmem:[%s951_s2 + $0x68] sm:$0xff]  ;;  %v276_v9 = vld [vmem:[%s952_s3 + $0x60] sm:$0xff]  ;;  %v275_v11 = vld [vmem:[%s952_s3 + $0x58] sm:$0xff]  ;;  %v717_v50 = vmov 2475754826   ;;  %s527_s29 = sshll.u32 %s722_s28, 4  ;;  %s528_s29 = int_to_ptr.vmem [resolvable:$true] %s527_s29 }
   0x6   :  { %589 = vmatprep.subr.mxu0 %v714_v2  ;;  %624 = vmatprep.subr.mxu1 %v714_v2  ;;  %v260_v10 = vld [vmem:[%s951_s2 + $0x60] sm:$0xff]  ;;  %v259_v12 = vld [vmem:[%s951_s2 + $0x58] sm:$0xff]  ;;  %v274_v13 = vld [vmem:[%s952_s3 + $0x50] sm:$0xff]  ;;  %v718_v53 = vmov 2131351028   ;;  %p696_p1 = scmp.lt.s32.totalorder %s528_s29, %s528_s29 }
   0x7   :  { %590 = vmatpush3.msra.mxu0 %v278_v5  ;;  %625 = vmatpush3.msra.mxu1 %v262_v6  ;;  %v258_v14 = vld [vmem:[%s951_s2 + $0x50] sm:$0xff]  ;;  %v273_v15 = vld [vmem:[%s952_s3 + $0x48] sm:$0xff]  ;;  %v272_v17 = vld [vmem:[%s952_s3 + $0x40] sm:$0xff]  ;;  %v719_v56 = vmov 2102212464  }
   0x8   :  { %591 = vmatprep.subr.mxu0 %v714_v2  ;;  %626 = vmatprep.subr.mxu1 %v714_v2  ;;  %v257_v16 = vld [vmem:[%s951_s2 + $0x48] sm:$0xff]  ;;  %v256_v18 = vld [vmem:[%s951_s2 + $0x40] sm:$0xff]  ;;  %v271_v19 = vld [vmem:[%s952_s3 + $0x38] sm:$0xff]  ;;  %v720_v59 = vmov 920167782  }
   0x9   :  { %592 = vmatpush3.msra.mxu0 %v277_v7  ;;  %627 = vmatpush3.msra.mxu1 %v261_v8  ;;  %v255_v20 = vld [vmem:[%s951_s2 + $0x38] sm:$0xff]  ;;  %v270_v21 = vld [vmem:[%s952_s3 + $0x30] sm:$0xff]  ;;  %v269_v23 = vld [vmem:[%s952_s3 + $0x28] sm:$0xff]  ;;  %v721_v62 = vmov 1326507024  }
   0xa   :  { %593 = vmatprep.subr.mxu0 %v714_v2  ;;  %628 = vmatprep.subr.mxu1 %v714_v2  ;;  %v254_v22 = vld [vmem:[%s951_s2 + $0x30] sm:$0xff]  ;;  %v253_v24 = vld [vmem:[%s951_s2 + $0x28] sm:$0xff]  ;;  %v268_v25 = vld [vmem:[%s952_s3 + $0x20] sm:$0xff] }
   0xb   :  { %594 = vmatpush3.msra.mxu0 %v276_v9  ;;  %629 = vmatpush3.msra.mxu1 %v260_v10  ;;  %v252_v26 = vld [vmem:[%s951_s2 + $0x20] sm:$0xff]  ;;  %v267_v27 = vld [vmem:[%s952_s3 + $0x18] sm:$0xff]  ;;  %v266_v29 = vld [vmem:[%s952_s3 + $0x10] sm:$0xff] }
   0xc   :  { %595 = vmatprep.subr.mxu0 %v714_v2  ;;  %630 = vmatprep.subr.mxu1 %v714_v2  ;;  %v251_v28 = vld [vmem:[%s951_s2 + $0x18] sm:$0xff]  ;;  %v250_v30 = vld [vmem:[%s951_s2 + $0x10] sm:$0xff]  ;;  %v265_v31 = vld [vmem:[%s952_s3 + $0x8] sm:$0xff] }
   0xd   :  { %596 = vmatpush3.msra.mxu0 %v275_v11  ;;  %631 = vmatpush3.msra.mxu1 %v259_v12  ;;  %v249_v32 = vld [vmem:[%s951_s2 + $0x8] sm:$0xff]  ;;  %v264_v33 = vld [vmem:[%s952_s3] sm:$0xff] }
   0xe   :  { %597 = vmatprep.subr.mxu0 %v714_v2  ;;  %632 = vmatprep.subr.mxu1 %v714_v2  ;;  %v248_v34 = vld [vmem:[%s951_s2] sm:$0xff] }
   0xf   :  { %598 = vmatpush3.msra.mxu0 %v274_v13  ;;  %633 = vmatpush3.msra.mxu1 %v258_v14  ;;  %v535_v35 = vld [vmem:[%s950_s1] ss:$0 sm:$0xff] }
  0x10   :  { %599 = vmatprep.subr.mxu0 %v714_v2  ;;  %634 = vmatprep.subr.mxu1 %v714_v2 }
  0x11   :  { %600 = vmatpush3.msra.mxu0 %v273_v15  ;;  %635 = vmatpush3.msra.mxu1 %v257_v16 }
  0x12   :  { %601 = vmatprep.subr.mxu0 %v714_v2  ;;  %636 = vmatprep.subr.mxu1 %v714_v2 }
  0x13   :  { %602 = vmatpush3.msra.mxu0 %v272_v17  ;;  %637 = vmatpush3.msra.mxu1 %v256_v18 }
  0x14   :  { %603 = vmatprep.subr.mxu0 %v714_v2  ;;  %638 = vmatprep.subr.mxu1 %v714_v2 }
  0x15   :  { %604 = vmatpush3.msra.mxu0 %v271_v19  ;;  %639 = vmatpush3.msra.mxu1 %v255_v20 }
  0x16   :  { %605 = vmatprep.subr.mxu0 %v714_v2  ;;  %640 = vmatprep.subr.mxu1 %v714_v2 }
  0x17   :  { %606 = vmatpush3.msra.mxu0 %v270_v21  ;;  %641 = vmatpush3.msra.mxu1 %v254_v22 }
  0x18   :  { %607 = vmatprep.subr.mxu0 %v714_v2  ;;  %642 = vmatprep.subr.mxu1 %v714_v2 }
  0x19   :  { %608 = vmatpush3.msra.mxu0 %v269_v23  ;;  %643 = vmatpush3.msra.mxu1 %v253_v24 }
  0x1a   :  { %609 = vmatprep.subr.mxu0 %v714_v2  ;;  %644 = vmatprep.subr.mxu1 %v714_v2 }
  0x1b   :  { %610 = vmatpush3.msra.mxu0 %v268_v25  ;;  %645 = vmatpush3.msra.mxu1 %v252_v26 }
  0x1c   :  { %611 = vmatprep.subr.mxu0 %v714_v2  ;;  %646 = vmatprep.subr.mxu1 %v714_v2 }
  0x1d   :  { %612 = vmatpush3.msra.mxu0 %v267_v27  ;;  %647 = vmatpush3.msra.mxu1 %v251_v28 }
  0x1e   :  { %613 = vmatprep.subr.mxu0 %v714_v2  ;;  %648 = vmatprep.subr.mxu1 %v714_v2 }
  0x1f   :  { %614 = vmatpush3.msra.mxu0 %v266_v29  ;;  %649 = vmatpush3.msra.mxu1 %v250_v30 }
  0x20   :  { %615 = vmatprep.subr.mxu0 %v714_v2  ;;  %650 = vmatprep.subr.mxu1 %v714_v2 }
  0x21   :  { %616 = vmatpush3.msra.mxu0 %v265_v31  ;;  %651 = vmatpush3.msra.mxu1 %v249_v32 }
  0x22   :  { %617 = vmatprep.subr.mxu0 %v714_v2  ;;  %652 = vmatprep.subr.mxu1 %v714_v2 }
  0x23   :  { %618 = vmatpush3.msra.mxu0 %v264_v33  ;;  %619 = vmatprep.mubr.msk.f32.mxu0 %vm715_vm0, %v714_v2 }
  0x24   :  { %653 = vmatpush3.msra.mxu1 %v248_v34  ;;  %654 = vmatprep.mubr.msk.f32.mxu1 %vm715_vm0, %v714_v2 }
  0x25   :  { %657 = vmatprep.subr.mxu0 %v714_v2 }
  0x7d   :  { %v32_v36 = vpop.permute.xlu0 %31 }
  0x7e   :  { %v902_v37 = vmul.f32 %v535_v35, %v32_v36 }
  0x80   :  { %v44_v38 = vand.u32 2139095040, %v902_v37  ;;  %v41_v42 = vand.u32 2147483647, %v902_v37  ;;  %vm43_vm8 = vcmp.lt.s32.totalorder %v902_v37, 0 }
  0x82   :  { %v45_v39 = vshrl.u32 %v44_v38, 23  ;;  %v48_v45 = vand.u32 8388607, %v41_v42  ;;  %vm42_vm9 = vcmp.le.f32.partialorder %v41_v42, 0.7853982 }
  0x84   :  { %v536_v40 = vadd.s32 4294967169, %v45_v39  ;;  %v49_v0 = vor.u32 8388608, %v48_v45 }
  0x86   :  { %v51_v41 = vadd.s32 1, %v536_v40  ;;  %v89_v15 = vshll.u32 %v49_v0, 8 }
  0x88   :  { %vm52_vm1 = vcmp.gt.s32.totalorder %v51_v41, 0 }
  0x89   :  { %v53_v43 = vsel %vm52_vm1, %v51_v41, 0  ;;  %vm133_vm1 = vweird.f32 %v902_v37 }
  0x8a   :  { %v55_v44 = vand.u32 31, %v53_v43  ;;  %v54_v47 = vshrl.u32 %v53_v43, 5 }
  0x8c   :  { %v56_v46 = vsub.s32 32, %v55_v44  ;;  %v58_v49 = vshll.u32 %v716_v48, %v55_v44  ;;  %v61_v51 = vshll.u32 %v717_v50, %v55_v44  ;;  %v64_v55 = vshll.u32 %v718_v53, %v55_v44 }
  0x8d   :  { %v67_v58 = vshll.u32 %v719_v56, %v55_v44  ;;  %v70_v61 = vshll.u32 %v720_v59, %v55_v44  ;;  %vm73_vm2 = vcmp.lt.s32.totalorder %v54_v47, 1  ;;  %vm76_vm3 = vcmp.lt.s32.totalorder %v54_v47, 4 }
  0x8e   :  { %v59_v52 = vshrl.u32 %v717_v50, %v56_v46  ;;  %v62_v54 = vshrl.u32 %v718_v53, %v56_v46  ;;  %v65_v57 = vshrl.u32 %v719_v56, %v56_v46  ;;  %v68_v60 = vshrl.u32 %v720_v59, %v56_v46 }
  0x8f   :  { %v71_v63 = vshrl.u32 %v721_v62, %v56_v46  ;;  %v57_v10 = vshrl.u32 %v716_v48, %v56_v46  ;;  %vm75_vm4 = vcmp.lt.s32.totalorder %v54_v47, 3  ;;  %vm74_vm5 = vcmp.lt.s32.totalorder %v54_v47, 2 }
  0x90   :  { %v60_v1 = vor.u32 %v59_v52, %v58_v49  ;;  %v63_v3 = vor.u32 %v62_v54, %v61_v51  ;;  %v66_v4 = vor.u32 %v65_v57, %v64_v55  ;;  %v69_v5 = vor.u32 %v68_v60, %v67_v58 }
  0x91   :  { %v72_v6 = vor.u32 %v71_v63, %v70_v61 }
  0x92   :  { %v78_v7 = vsel %vm76_vm3, %v66_v4, 2102212464  ;;  %v81_v8 = vsel %vm73_vm2, %v60_v1, %v63_v3  ;;  %v85_v9 = vsel %vm73_vm2, %v63_v3, %v66_v4  ;;  %v82_v11 = vsel %vm76_vm3, %v69_v5, 920167782 }
  0x93   :  { %v86_v12 = vsel %vm76_vm3, %v72_v6, 1326507024  ;;  %v83_v13 = vsel %vm75_vm4, %v66_v4, %v82_v11  ;;  %v77_v16 = vsel %vm73_vm2, %v57_v10, %v60_v1  ;;  %v79_v17 = vsel %vm75_vm4, %v63_v3, %v78_v7  ;;  %v436_v10 = vld [vmem:[%s954_s5 + $0x8] sm:$0xff]  ;;  %v435_v11 = vld [vmem:[%s954_s5] sm:$0xff] }
  0x94   :  { %v87_v14 = vsel %vm75_vm4, %v69_v5, %v86_v12  ;;  %v84_v18 = vsel %vm74_vm5, %v81_v8, %v83_v13  ;;  %v80_v24 = vsel %vm74_vm5, %v77_v16, %v79_v17 }
  0x95   :  { %v88_v19 = vsel %vm74_vm5, %v85_v9, %v87_v14  ;;  %v911_v22 = vmul.u32.u64.low %v89_v15, %v84_v18  ;;  %v912_v23 = vmul.u32.u64.high %v89_v15, %v84_v18, %v911_v22  ;;  %v96_v26 = vmul.u32 %v89_v15, %v80_v24  ;;  %v438_v9 = vld [vmem:[%s954_s5 + $0x18] sm:$0xff]  ;;  %v544_v14 = vld [vmem:[%s953_s4] ss:$0 sm:$0xff]  ;;  %s691_s4 = scalar_lea.vmem %s528_s29, 128 }
  0x96   :  { %v908_v20 = vmul.u32.u64.low %v89_v15, %v88_v19  ;;  %v909_v21 = vmul.u32.u64.high %v89_v15, %v88_v19, %v908_v20  ;;  %p692_p0 = scmp.ne.s32.totalorder %s528_s29, %s691_s4  ;;  %p697_p2 = scmp.lt.s32.totalorder %s691_s4, %s691_s4 }
  0x97   :  { %v99_v25 = vadd.s32 1, %v912_v23 }
  0x98   :  { %vm98_vm6 = vc.u32 %v909_v21, %v911_v22  ;;  %v97_v39 = vadd.s32 %v911_v22, %v909_v21  ;;  %p698_p3 = por %p697_p2, %p696_p1 }
  0x99   :  { %v100_v27 = vsel %vm98_vm6, %v99_v25, %v912_v23 }
  0x9a   :  { %v101_v28 = vadd.s32 %v100_v27, %v96_v26  ;;  %p699_p4 = pnand %p698_p3, %p692_p0 }
  0x9c   :  { %v102_v29 = vadd.s32 536870912, %v101_v28 }
  0x9e   :  { %v103_v30 = vshrl.u32 %v102_v29, 30 }
  0xa0   :  { %v104_v31 = vshll.u32 %v103_v30, 30  ;;  %v127_v53 = vsub.s32 4, %v103_v30 }
  0xa2   :  { %v105_v32 = vsub.s32 %v101_v28, %v104_v31  ;;  %v128_v56 = vsel %vm43_vm8, %v127_v53, %v103_v30 }
  0xa3   :  { %v130_v57 = vsel %vm42_vm9, 0, %v128_v56 }
  0xa4   :  { %v107_v33 = vsub.s32 0, %v105_v32  ;;  %v237_v58 = vadd.s32 3, %v130_v57  ;;  %v134_v60 = vand.u32 3, %v130_v57 }
  0xa6   :  { %v537_v34 = vmin.u32 %v107_v33, %v105_v32  ;;  %v238_v59 = vand.u32 3, %v237_v58  ;;  %vm139_vm11 = vcmp.eq.s32.totalorder %v134_v60, 2  ;;  %vm136_vm13 = vcmp.eq.s32.totalorder %v134_v60, 0 }
  0xa7   :  { %vm135_vm15 = vcmp.lt.s32.totalorder %v134_v60, 2 }
  0xa8   :  { %v109_v35 = vclz %v537_v34  ;;  %vm243_vm10 = vcmp.eq.s32.totalorder %v238_v59, 2  ;;  %vm240_vm12 = vcmp.eq.s32.totalorder %v238_v59, 0  ;;  %vm239_vm14 = vcmp.lt.s32.totalorder %v238_v59, 2 }
  0xaa   :  { %v538_v36 = vadd.s32 4294967294, %v109_v35 }
  0xac   :  { %vm539_vm7 = vcmp.lt.s32.totalorder %v538_v36, 0 }
  0xad   :  { %v112_v38 = vsel %vm539_vm7, 0, %v538_v36 }
  0xae   :  { %v113_v40 = vsub.s32 32, %v112_v38  ;;  %v117_v41 = vsub.s32 4294967266, %v112_v38  ;;  %v114_v43 = vshll.u32 %v105_v32, %v112_v38 }
  0xb0   :  { %v115_v44 = vshrl.u32 %v97_v39, %v113_v40  ;;  %v118_v45 = vadd.s32 127, %v117_v41 }
  0xb2   :  { %v116_v46 = vor.u32 %v115_v44, %v114_v43  ;;  %v119_v47 = vshll.u32 %v118_v45, 23 }
  0xb4   :  { %v120_v48 = vor.u32 4788187, %v119_v47  ;;  %v123_v50 = vcvt.s32.f32 %v116_v46 }
  0xb6   :  { %v121_v49 = vand.u32 2147483647, %v120_v48 }
  0xb8   :  { %v124_v51 = vmul.f32 %v123_v50, %v121_v49 }
  0xba   :  { %v125_v52 = vxor.u32 2147483648, %v124_v51 }
  0xbc   :  { %v126_v54 = vsel %vm43_vm8, %v125_v52, %v124_v51 }
  0xbd   :  { %v129_v55 = vsel %vm42_vm9, %v902_v37, %v126_v54  ;;  %v437_v37 = vld [vmem:[%s954_s5 + $0x10] sm:$0xff] }
  0xbe   :  { %683 = vcosq.f32 %v129_v55 }
  0xbf   :  { %685 = vsinq.f32 %v129_v55 }
  0xcb   :  { %v684_v61 = vpop.eup %683 }
  0xcc   :  { %v686_v62 = vpop.eup %685  ;;  %v140_v63 = vxor.u32 2147483648, %v684_v61 }
  0xcd   :  { %v137_v0 = vxor.u32 2147483648, %v686_v62 }
  0xce   :  { %v245_v1 = vsel %vm243_vm10, %v140_v63, %v686_v62  ;;  %v141_v3 = vsel %vm139_vm11, %v140_v63, %v686_v62 }
  0xcf   :  { %v242_v42 = vsel %vm240_vm12, %v684_v61, %v137_v0  ;;  %v138_v4 = vsel %vm136_vm13, %v684_v61, %v137_v0 }
  0xd0   :  { %v246_v5 = vsel %vm239_vm14, %v242_v42, %v245_v1  ;;  %v142_v6 = vsel %vm135_vm15, %v138_v4, %v141_v3 }
  0xd1   :  { %v247_v7 = vsel %vm133_vm1, nan, %v246_v5  ;;  %v143_v8 = vsel %vm133_vm1, nan, %v142_v6 }
  0xd2   :  { %620 = vmatmul.mubr.f32.vlgmr.msra.gmra.mxu0 %v247_v7  ;;  %655 = vmatmul.mubr.f32.vlgmr.msra.gmra.mxu1 %v143_v8 }
  0xd3   :  { %665 = vmatprep.mubr.msk.f32.mxu0 %vm715_vm0, %v714_v2  ;;  %658 = vmatpush3.msra.mxu0 %v438_v9  ;;  %vm446_vm0 = vcmask 261120  }
  0xd4   :  { %659 = vmatprep.subr.mxu0 %v714_v2 }
  0xd5   :  { %660 = vmatpush3.msra.mxu0 %v437_v37 }
  0xd6   :  { %661 = vmatprep.subr.mxu0 %v714_v2 }
  0xd7   :  { %662 = vmatpush3.msra.mxu0 %v436_v10 }
  0xd8   :  { %663 = vmatprep.subr.mxu0 %v714_v2  ;;  %v546_v2 = vld [vmem:[%s955_s6] ss:$0 sm:$0xff] }
  0xd9   :  { %664 = vmatpush3.msra.mxu0 %v435_v11 }
 0x192   :  { %v346_v12 = vpop.f32.mrf.mxu0  ;;  %v416_v13 = vpop.f32.mrf.mxu1 }
 0x193   :  { %v417_v15 = vadd.f32 %v416_v13, %v346_v12 }
 0x194   :  { %v621_v16 = vpop.f32.mrf.mxu0  ;;  %v656_v17 = vpop.f32.mrf.mxu1 }
 0x195   :  { %v427_v18 = vadd.f32 %v544_v14, %v417_v15 }
 0x197   :  { %v545_v19 = vmul.f32 -1.442695, %v427_v18 }
 0x199   :  { %687 = vpow2.f32 %v545_v19 }
 0x1a6   :  { %v688_v20 = vpop.eup %687 }
 0x1a7   :  { %v431_v21 = vadd.f32 1.0, %v688_v20 }
 0x1a9   :  { %689 = vrcp.f32 %v431_v21 }
 0x1b6   :  { %v690_v22 = vpop.eup %689 }
 0x1b7   :  { %v434_v23 = vmul.f32 %v690_v22, %v427_v18 }
 0x1b9   :  { %666 = vmatmul.mubr.msk.f32.vlgmr.msra.gmra.mxu0 %vm446_vm0, %v434_v23 }
 0x279   :  { %v516_v24 = vpop.f32.mrf.mxu0 }
 0x27a   :  { %v517_v25 = vadd.f32 %v546_v2, %v516_v24 }
 0x27b   :  { %v667_v26 = vpop.f32.mrf.mxu0 }
 0x27c   :  { %520 = vst.msk [vmem:[#allocation2] sm:$0xff] %vm446_vm0, %v517_v25 }
 0x27d   :  { %702 = shalt.err (!%p699_p4)
}
 0x27e   :  { %530 = dma.vmem_to_hbm [thread:$0]  %s528_s29, 128, %s956_s7, [#allocation3]  }
 0x27f   :  { %711 = dma.done.wait [#allocation3], 128  }
 0x280   :  { %712 = vsyncadd [#allocation3], 4294967168 }
 0x281   :  { %534 = vsyncpa [#allocation3], 1 }

</bundles_post_ra>
